<compile_context>
chip_gen: v7x
topology: tpu7x:2x2x1
jax: 0.10.0
libtpu: 0.0.40
codegen_flags: <defaults>
</compile_context>

<pallas_src>
import functools

import jax
import jax.numpy as jnp
from jax.experimental import pallas as pl
from jax.experimental.pallas import tpu as pltpu

_NEG = -1e30            # fill for padded vocab columns (finite: 0 * _NEG == 0)
_DEFAULT_ROW_TILE = 1024
_MIN_SPLIT_TILE = 512   # minimum per-TensorCore block when splitting for 2 TCs


# ---------------------------------------------------------------------------
# Kernels
# ---------------------------------------------------------------------------

def _bigram_train_kernel(idx_ref, tgt_ref, emb_ref, logits_ref, nll_ref):
    # idx_ref / tgt_ref : (TM, 1)  int32
    # emb_ref           : (VP, VP) float32 (vocab-padded table, resident)
    # logits_ref        : (TM, VP) float32 block over a (N_pad, V) array:
    #                     Pallas writes back only the V valid columns.
    # nll_ref           : (TM, 1)  float32 (per-row NLL; mean taken outside)
    tm = idx_ref.shape[0]
    vp = emb_ref.shape[0]

    col = jax.lax.broadcasted_iota(jnp.int32, (tm, vp), 1)          # (TM, VP)

    # Embedding lookup as one-hot matmul (MXU).  Padded table rows are never
    # selected because idx < V.  f32 path is exact: exactly one 1.0 per row
    # picks an unrounded f32 table entry.
    one_hot = (col == idx_ref[...]).astype(jnp.float32)             # (TM, VP)
    logits = jnp.dot(one_hot, emb_ref[...],
                     preferred_element_type=jnp.float32)            # (TM, VP)
    logits_ref[...] = logits

    # Cross-entropy: logsumexp(logits) - logits[target], per row.  Padded
    # lanes hold -1e30 -> exp() underflows to exactly 0, max unaffected.
    m = jnp.max(logits, axis=-1, keepdims=True)                     # (TM, 1)
    lse = m + jnp.log(jnp.sum(jnp.exp(logits - m), axis=-1, keepdims=True))
    picked = jnp.sum(jnp.where(col == tgt_ref[...], logits, 0.0),
                     axis=-1, keepdims=True)                        # (TM, 1)
    nll_ref[...] = lse - picked


def _bigram_loss_kernel(idx_ref, tgt_ref, emb_ref, nll_ref):
    # Loss-only training path: no logits output at all (logits are >99% of
    # the HBM writes), only the per-row NLL is stored.
    tm = idx_ref.shape[0]
    vp = emb_ref.shape[0]
    col = jax.lax.broadcasted_iota(jnp.int32, (tm, vp), 1)
    one_hot = (col == idx_ref[...]).astype(jnp.float32)
    logits = jnp.dot(one_hot, emb_ref[...],
                     preferred_element_type=jnp.float32)
    m = jnp.max(logits, axis=-1, keepdims=True)
    lse = m + jnp.log(jnp.sum(jnp.exp(logits - m), axis=-1, keepdims=True))
    picked = jnp.sum(jnp.where(col == tgt_ref[...], logits, 0.0),
                     axis=-1, keepdims=True)
    nll_ref[...] = lse - picked


def _bigram_logits_kernel(idx_ref, emb_ref, logits_ref):
    # Inference path: no target DMA, no cross-entropy, no loss output.
    tm = idx_ref.shape[0]
    vp = emb_ref.shape[0]
    col = jax.lax.broadcasted_iota(jnp.int32, (tm, vp), 1)
    one_hot = (col == idx_ref[...]).astype(jnp.float32)
    logits_ref[...] = jnp.dot(one_hot, emb_ref[...],
                              preferred_element_type=jnp.float32)


# ---------------------------------------------------------------------------
# Jitted end-to-end forwards (padding + pallas_call + slice/mean all fused)
# ---------------------------------------------------------------------------

def _pad_inputs(emb, idx, targets, n, n_pad, v, vp):
    # Pad the table: rows >= V are never selected; columns >= V get -1e30 so
    # the in-kernel max/logsumexp ignore them (do NOT use -inf: 0*-inf = NaN).
    emb_p = jnp.full((vp, vp), _NEG, jnp.float32).at[:v, :v].set(
        emb.astype(jnp.float32))
    idx_flat = jnp.zeros((n_pad, 1), jnp.int32).at[:n, 0].set(
        idx.reshape(-1).astype(jnp.int32))
    tgt_flat = None
    if targets is not None:
        tgt_flat = jnp.zeros((n_pad, 1), jnp.int32).at[:n, 0].set(
            targets.reshape(-1).astype(jnp.int32))
    return emb_p, idx_flat, tgt_flat


@functools.partial(jax.jit, static_argnames=("row_tile",))
def _forward_train(emb, idx, targets, *, row_tile):
    b, t = idx.shape
    v = emb.shape[0]
    n = b * t
    rt = row_tile
    n_pad = ((n + rt - 1) // rt) * rt
    vp = ((v + 127) // 128) * 128
    emb_p, idx_flat, tgt_flat = _pad_inputs(emb, idx, targets, n, n_pad, v, vp)

    logits_p, nll = pl.pallas_call(
        _bigram_train_kernel,
        out_shape=(
            jax.ShapeDtypeStruct((n_pad, v), jnp.float32),   # lane-masked writeback
            jax.ShapeDtypeStruct((n_pad, 1), jnp.float32),
        ),
        grid_spec=pltpu.PrefetchScalarGridSpec(
            num_scalar_prefetch=0,
            grid=(n_pad // rt,),
            in_specs=[
                pl.BlockSpec((rt, 1), lambda i: (i, 0)),      # idx rows
                pl.BlockSpec((rt, 1), lambda i: (i, 0)),      # target rows
                pl.BlockSpec((vp, vp), lambda i: (0, 0)),     # full table (resident)
            ],
            out_specs=[
                # Block is (rt, VP) over a (n_pad, V) array: only V columns
                # are written back to HBM (no 2x padded logits traffic).
                pl.BlockSpec((rt, vp), lambda i: (i, 0)),
                pl.BlockSpec((rt, 1), lambda i: (i, 0)),
            ],
        ),
        compiler_params=pltpu.CompilerParams(
            dimension_semantics=("parallel",)),
    )(idx_flat, tgt_flat, emb_p)

    logits = logits_p[:n].reshape(b, t, v)     # no-op when n == n_pad
    loss = jnp.mean(nll[:n, 0])                # padded rows excluded
    return logits, loss


@functools.partial(jax.jit, static_argnames=("row_tile",))
def _forward_loss_only(emb, idx, targets, *, row_tile):
    b, t = idx.shape
    v = emb.shape[0]
    n = b * t
    rt = row_tile
    n_pad = ((n + rt - 1) // rt) * rt
    vp = ((v + 127) // 128) * 128
    emb_p, idx_flat, tgt_flat = _pad_inputs(emb, idx, targets, n, n_pad, v, vp)

    nll = pl.pallas_call(
        _bigram_loss_kernel,
        out_shape=jax.ShapeDtypeStruct((n_pad, 1), jnp.float32),
        grid_spec=pltpu.PrefetchScalarGridSpec(
            num_scalar_prefetch=0,
            grid=(n_pad // rt,),
            in_specs=[
                pl.BlockSpec((rt, 1), lambda i: (i, 0)),
                pl.BlockSpec((rt, 1), lambda i: (i, 0)),
                pl.BlockSpec((vp, vp), lambda i: (0, 0)),
            ],
            out_specs=pl.BlockSpec((rt, 1), lambda i: (i, 0)),
        ),
        compiler_params=pltpu.CompilerParams(
            dimension_semantics=("parallel",)),
    )(idx_flat, tgt_flat, emb_p)
    return jnp.mean(nll[:n, 0])


@functools.partial(jax.jit, static_argnames=("row_tile",))
def _forward_infer(emb, idx, *, row_tile):
    b, t = idx.shape
    v = emb.shape[0]
    n = b * t
    rt = row_tile
    n_pad = ((n + rt - 1) // rt) * rt
    vp = ((v + 127) // 128) * 128
    emb_p, idx_flat, _ = _pad_inputs(emb, idx, None, n, n_pad, v, vp)

    logits_p = pl.pallas_call(
        _bigram_logits_kernel,
        out_shape=jax.ShapeDtypeStruct((n_pad, v), jnp.float32),
        grid_spec=pltpu.PrefetchScalarGridSpec(
            num_scalar_prefetch=0,
            grid=(n_pad // rt,),
            in_specs=[
                pl.BlockSpec((rt, 1), lambda i: (i, 0)),
                pl.BlockSpec((vp, vp), lambda i: (0, 0)),
            ],
            out_specs=pl.BlockSpec((rt, vp), lambda i: (i, 0)),
        ),
        compiler_params=pltpu.CompilerParams(
            dimension_semantics=("parallel",)),
    )(idx_flat, emb_p)
    return logits_p[:n].reshape(b, t, v)


# ---------------------------------------------------------------------------
# Tiling policy & public API
# ---------------------------------------------------------------------------

def _num_tensorcores_per_device():
    """Best-effort TensorCores-per-JAX-device (v4/v5p megacore, v7x -> 2).

    On single-TC chips (v5e, v6e) the grid is a serial loop, so splitting a
    covering tile into multiple blocks is pure per-step overhead.
    """
    try:
        kind = str(getattr(jax.devices()[0], "device_kind", "")).lower()
        if any(tag in kind for tag in ("v4", "v5p", "v7", "7x")):
            return 2
    except Exception:
        pass
    return 1


def _choose_row_tile(n, requested):
    """Largest row tile (multiple of 8, capped at `requested`) covering n.

    Only on multi-TensorCore devices, and only when n is large enough that
    both halves stay >= _MIN_SPLIT_TILE rows, split into >= 2 blocks so both
    TCs get work under dimension_semantics=('parallel',).
    """
    rt = max(8, (int(requested) // 8) * 8)
    cover = ((n + 7) // 8) * 8
    rt = min(rt, cover)
    if _num_tensorcores_per_device() >= 2 and n >= 2 * _MIN_SPLIT_TILE:
        half = (((n + 1) // 2) + 7) // 8 * 8
        rt = min(rt, max(_MIN_SPLIT_TILE, half))
    return rt


def bigram_forward(emb, idx, targets=None, *, row_tile=_DEFAULT_ROW_TILE):
    """Matches BigramLanguageModel.forward.

    emb:     (V, V) float32 embedding table
    idx:     (B, T) int token ids
    targets: (B, T) int token ids or None
    returns: (logits (B, T, V) f32, loss scalar f32 or None)
    """
    b, t = idx.shape
    rt = _choose_row_tile(b * t, row_tile)
    if targets is None:
        return _forward_infer(emb, idx, row_tile=rt), None
    return _forward_train(emb, idx, targets, row_tile=rt)


def bigram_loss(emb, idx, targets, *, row_tile=_DEFAULT_ROW_TILE):
    """Loss-only training step helper: skips the logits HBM write entirely."""
    b, t = idx.shape
    rt = _choose_row_tile(b * t, row_tile)
    return _forward_loss_only(emb, idx, targets, row_tile=rt)


# TODO(synk): `generate` (autoregressive multinomial sampling loop) is
# host-side control flow around this forward pass, not a kernel.


if __name__ == "__main__":
    vocab_size = 65
    B, T = 2, 8

    key = jax.random.PRNGKey(0)
    k_emb, k_idx, k_tgt = jax.random.split(key, 3)

    # nn.Embedding default init: N(0, 1).
    emb = jax.random.normal(k_emb, (vocab_size, vocab_size), jnp.float32)
    idx = jax.random.randint(k_idx, (B, T), 0, vocab_size, jnp.int32)
    targets = jax.random.randint(k_tgt, (B, T), 0, vocab_size, jnp.int32)

    logits, loss = bigram_forward(emb, idx, targets)
    jax.block_until_ready((logits, loss))

    # Plain-JAX reference (embedding gather + mean cross-entropy).
    def ref_forward(emb, idx, targets):
        ref_logits = emb[idx]
        flat = ref_logits.reshape(-1, emb.shape[0])
        lse = jax.scipy.special.logsumexp(flat, axis=-1)
        picked = jnp.take_along_axis(flat, targets.reshape(-1, 1), axis=-1)[:, 0]
        return ref_logits, jnp.mean(lse - picked)

    ref_logits, ref_loss = ref_forward(emb, idx, targets)
    assert logits.shape == (B, T, vocab_size)
    assert jnp.allclose(logits, ref_logits, atol=1e-5, rtol=1e-5)
    assert jnp.allclose(loss, ref_loss, atol=1e-5, rtol=1e-5)

    # Loss-only variant (no logits HBM writes at all).
    loss_only = bigram_loss(emb, idx, targets)
    jax.block_until_ready(loss_only)
    assert jnp.allclose(loss_only, ref_loss, atol=1e-5, rtol=1e-5)

    # targets=None (inference) branch: lean kernel, no loss.
    logits_only, none_loss = bigram_forward(emb, idx, None)
    jax.block_until_ready(logits_only)
    assert none_loss is None
    assert jnp.allclose(logits_only, ref_logits, atol=1e-5, rtol=1e-5)

    # A second, non-aligned shape to exercise row padding / boundary masking.
    B2, T2 = 4, 37
    idx2 = jax.random.randint(k_idx, (B2, T2), 0, vocab_size, jnp.int32)
    tgt2 = jax.random.randint(k_tgt, (B2, T2), 0, vocab_size, jnp.int32)
    logits2, loss2 = bigram_forward(emb, idx2, tgt2)
    jax.block_until_ready((logits2, loss2))
    ref_logits2, ref_loss2 = ref_forward(emb, idx2, tgt2)
    assert jnp.allclose(logits2, ref_logits2, atol=1e-5, rtol=1e-5)
    assert jnp.allclose(loss2, ref_loss2, atol=1e-5, rtol=1e-5)
    assert jnp.allclose(bigram_loss(emb, idx2, tgt2), ref_loss2,
                        atol=1e-5, rtol=1e-5)

    print("KERNEL_OK")
</pallas_src>

<mosaic_0001>
module attributes {stable_mosaic.version = 11 : i64} {
  func.func @_bigram_train_kernel(%arg0: i32, %arg1: memref<16x1xi32, #tpu.memory_space<vmem>>, %arg2: memref<16x1xi32, #tpu.memory_space<vmem>>, %arg3: memref<128x128xf32, #tpu.memory_space<vmem>>, %arg4: memref<16x128xf32, #tpu.memory_space<vmem>>, %arg5: memref<16x1xf32, #tpu.memory_space<vmem>>) attributes {dimension_semantics = [#tpu.dimension_semantics<parallel>], iteration_bounds = array<i64: 1>, scalar_prefetch = 0 : i64, scratch_operands = 0 : i64, tpu.core_type = #tpu.core_type<tc>, window_params = [{transform_indices = @transform_0, window_bounds = array<i64: 16, 1>}, {transform_indices = @transform_1, window_bounds = array<i64: 16, 1>}, {pipeline_mode = #tpu.pipeline_mode<synchronous>, transform_indices = @transform_2, window_bounds = array<i64: 128, 128>}, {transform_indices = @transform_3, window_bounds = array<i64: 16, 128>}, {transform_indices = @transform_4, window_bounds = array<i64: 16, 1>}]} {
    %0 = tpu.iota {dimensions = array<i32: 1>} : vector<16x128xi32>
    %c0 = arith.constant 0 : index
    %c0_0 = arith.constant 0 : index
    %1 = vector.load %arg1[%c0, %c0_0] : memref<16x1xi32, #tpu.memory_space<vmem>>, vector<16x1xi32>
    %2 = vector.broadcast %1 : vector<16x1xi32> to vector<16x128xi32>
    %3 = arith.cmpi eq, %0, %2 : vector<16x128xi32>
    %4 = arith.extui %3 : vector<16x128xi1> to vector<16x128xi32>
    %5 = arith.sitofp %4 : vector<16x128xi32> to vector<16x128xf32>
    %c0_1 = arith.constant 0 : index
    %c0_2 = arith.constant 0 : index
    %6 = vector.load %arg3[%c0_1, %c0_2] : memref<128x128xf32, #tpu.memory_space<vmem>>, vector<128x128xf32>
    %cst = arith.constant dense<0.000000e+00> : vector<16x128xf32>
    %7 = tpu.matmul %5, %6, %cst {dimension_numbers = #tpu.dot_dimension_numbers<[1], [0], [0], [1], [0, 0, 1, 1], [], []>} : vector<16x128xf32>, vector<128x128xf32>, vector<16x128xf32> -> vector<16x128xf32>
    %c0_3 = arith.constant 0 : index
    %c0_4 = arith.constant 0 : index
    %8 = vector.load %arg4[%c0_3, %c0_4] : memref<16x128xf32, #tpu.memory_space<vmem>>, vector<16x128xf32>
    tpu.vector_store %arg4[%c0_3, %c0_4], %7 {strides = array<i32>} : memref<16x128xf32, #tpu.memory_space<vmem>>, vector<16x128xf32>,
    %cst_5 = arith.constant dense<0xFF800000> : vector<16xf32>
    %9 = vector.multi_reduction <maximumf>, %7, %cst_5 [1] : vector<16x128xf32> to vector<16xf32>
    %10 = vector.shape_cast %9 : vector<16xf32> to vector<16x1xf32>
    %11 = vector.broadcast %10 : vector<16x1xf32> to vector<16x128xf32>
    %12 = arith.subf %7, %11 : vector<16x128xf32>
    %13 = math.exp %12 : vector<16x128xf32>
    %cst_6 = arith.constant dense<0.000000e+00> : vector<16xf32>
    %14 = vector.multi_reduction <add>, %13, %cst_6 [1] : vector<16x128xf32> to vector<16xf32>
    %15 = vector.shape_cast %14 : vector<16xf32> to vector<16x1xf32>
    %16 = math.log %15 : vector<16x1xf32>
    %17 = arith.addf %10, %16 : vector<16x1xf32>
    %c0_7 = arith.constant 0 : index
    %c0_8 = arith.constant 0 : index
    %18 = vector.load %arg2[%c0_7, %c0_8] : memref<16x1xi32, #tpu.memory_space<vmem>>, vector<16x1xi32>
    %19 = vector.broadcast %18 : vector<16x1xi32> to vector<16x128xi32>
    %20 = arith.cmpi eq, %0, %19 : vector<16x128xi32>
    %cst_9 = arith.constant 0.000000e+00 : f32
    %21 = vector.broadcast %cst_9 : f32 to vector<16x128xf32>
    %22 = arith.select %20, %7, %21 : vector<16x128xi1>, vector<16x128xf32>
    %cst_10 = arith.constant dense<0.000000e+00> : vector<16xf32>
    %23 = vector.multi_reduction <add>, %22, %cst_10 [1] : vector<16x128xf32> to vector<16xf32>
    %24 = vector.shape_cast %23 : vector<16xf32> to vector<16x1xf32>
    %25 = arith.subf %17, %24 : vector<16x1xf32>
    %c0_11 = arith.constant 0 : index
    %c0_12 = arith.constant 0 : index
    %26 = vector.load %arg5[%c0_11, %c0_12] : memref<16x1xf32, #tpu.memory_space<vmem>>, vector<16x1xf32>
    tpu.vector_store %arg5[%c0_11, %c0_12], %25 {strides = array<i32>} : memref<16x1xf32, #tpu.memory_space<vmem>>, vector<16x1xf32>,
    return
  }
  func.func @transform_0(%arg0: i32) -> (i32, i32) {
    %c0_i32 = arith.constant 0 : i32
    %c0_i32_0 = arith.constant 0 : i32
    return %arg0, %c0_i32 : i32, i32
  }
  func.func @transform_1(%arg0: i32) -> (i32, i32) {
    %c0_i32 = arith.constant 0 : i32
    %c0_i32_0 = arith.constant 0 : i32
    return %arg0, %c0_i32 : i32, i32
  }
  func.func @transform_2(%arg0: i32) -> (i32, i32) {
    %c0_i32 = arith.constant 0 : i32
    %c0_i32_0 = arith.constant 0 : i32
    %c0_i32_1 = arith.constant 0 : i32
    return %c0_i32, %c0_i32_0 : i32, i32
  }
  func.func @transform_3(%arg0: i32) -> (i32, i32) {
    %c0_i32 = arith.constant 0 : i32
    %c0_i32_0 = arith.constant 0 : i32
    return %arg0, %c0_i32 : i32, i32
  }
  func.func @transform_4(%arg0: i32) -> (i32, i32) {
    %c0_i32 = arith.constant 0 : i32
    %c0_i32_0 = arith.constant 0 : i32
    return %arg0, %c0_i32 : i32, i32
  }
}

</mosaic_0001>

<bundles_post_ra>
// kernel: _forward_train.1
= control target key start
LH: loop header
LB: loop body
LE: loop exit
PB: predicated region body
PF: predicated region fallthrough
CT: control target
= control target key end

     0   :  { %v315_v1 = vmov 0   ;;  %s423_s0 = inlined_call_operand.vmem [shape: s32[16,1], index: 0, kind: input, shape index: {}]   ;;  %s424_s1 = inlined_call_operand.vmem [shape: s32[16,1], index: 1, kind: input, shape index: {}]   ;;  %s425_s2 = inlined_call_operand.vmem [shape: f32[128,128], index: 2, kind: input, shape index: {}]   ;;  %s426_s3 = inlined_call_operand.hbm [shape: f32[16,65], index: 3, kind: output, shape index: {0}]   ;;  %s427_s4 = inlined_call_operand.vmem [shape: f32[16,1], index: 4, kind: output, shape index: {1}]  }
   0x1   :  { %v19_v0 = vld [vmem:[%s423_s0] sm:$0xff]  ;;  %281 = vset.pattern.permute.xlu0 %v315_v1  ;;  %v34_v3 = vld [vmem:[%s425_s2 + $0x8] sm:$0xff]  ;;  %v35_v4 = vld [vmem:[%s425_s2 + $0x10] sm:$0xff]  ;;  %282 = vset.pattern.permute.xlu1 %v315_v1 }
   0x2   :  { %v33_v2 = vld [vmem:[%s425_s2] sm:$0xff]  ;;  %22 = vperm.xlu0 %281, %v19_v0   ;;  %v36_v6 = vld [vmem:[%s425_s2 + $0x18] sm:$0xff]  ;;  %v20_v7 = vld [vmem:[%s423_s0 + $0x8] sm:$0xff] }
   0x3   :  { %v244_v5 = vpack.c.bf16 %v34_v3, %v33_v2  ;;  %v248_v8 = vpack.c.bf16 %v36_v6, %v35_v4  ;;  %v37_v9 = vld [vmem:[%s425_s2 + $0x20] sm:$0xff]  ;;  %v38_v10 = vld [vmem:[%s425_s2 + $0x28] sm:$0xff] }
   0x4   :  { %v252_v11 = vpack.c.bf16 %v38_v10, %v37_v9 }
   0x5   :  { %245 = vmatprep.subr.bf16.mxu0 %v244_v5 }
   0x6   :  { %247 = vmatpush3.bf16.msra.mxu0 %v244_v5  ;;  %25 = vperm.xlu0 %281, %v20_v7  }
   0x7   :  { %249 = vmatprep.subr.bf16.mxu0 %v248_v8 }
   0x8   :  { %10 = vsyncpa [#allocation3], 0  ;;  %v146_v12 = vld [vmem:[%s424_s1] sm:$0xff]  ;;  %v39_v13 = vld [vmem:[%s425_s2 + $0x30] sm:$0xff]  ;;  %v17_v28 = vlaneseq  ;;  %v316_v31 = vmov 1.0  }
   0x9   :  { %v40_v14 = vld [vmem:[%s425_s2 + $0x38] sm:$0xff]  ;;  %v41_v16 = vld [vmem:[%s425_s2 + $0x40] sm:$0xff]  ;;  %v42_v17 = vld [vmem:[%s425_s2 + $0x48] sm:$0xff] }
   0xa   :  { %251 = vmatpush3.bf16.msra.mxu0 %v248_v8  ;;  %149 = vperm.xlu0 %281, %v146_v12   ;;  %v256_v15 = vpack.c.bf16 %v40_v14, %v39_v13  ;;  %v260_v18 = vpack.c.bf16 %v42_v17, %v41_v16  ;;  %v43_v19 = vld [vmem:[%s425_s2 + $0x50] sm:$0xff]  ;;  %v44_v20 = vld [vmem:[%s425_s2 + $0x58] sm:$0xff]  ;;  %v45_v22 = vld [vmem:[%s425_s2 + $0x60] sm:$0xff]  ;;  %v18_v29 = vand.u32 127, %v17_v28 }
   0xb   :  { %253 = vmatprep.subr.bf16.mxu0 %v252_v11  ;;  %v264_v21 = vpack.c.bf16 %v44_v20, %v43_v19  ;;  %v46_v23 = vld [vmem:[%s425_s2 + $0x68] sm:$0xff]  ;;  %v47_v25 = vld [vmem:[%s425_s2 + $0x70] sm:$0xff]  ;;  %v48_v26 = vld [vmem:[%s425_s2 + $0x78] sm:$0xff] }
   0xc   :  { %v268_v24 = vpack.c.bf16 %v46_v23, %v45_v22  ;;  %v272_v27 = vpack.c.bf16 %v48_v26, %v47_v25  ;;  %v147_v35 = vld [vmem:[%s424_s1 + $0x8] sm:$0xff]  ;;  %s317_s1 = smov [#allocation2]  }
   0xd   :  { %s172_s27 = sshll.u32 %s317_s1, 4  ;;  %s173_s27 = int_to_ptr.vmem [resolvable:$true] %s172_s27 }
   0xe   :  { %255 = vmatpush3.bf16.msra.mxu0 %v252_v11  ;;  %s291_s28 = scalar_lea.vmem %s173_s27, 256  ;;  %p296_p1 = scmp.lt.s32.totalorder %s173_s27, %s173_s27 }
   0xf   :  { %257 = vmatprep.subr.bf16.mxu0 %v256_v15  ;;  %p292_p0 = scmp.ne.s32.totalorder %s173_s27, %s291_s28  ;;  %p297_p2 = scmp.lt.s32.totalorder %s291_s28, %s291_s28 }
  0x11   :  { %p298_p3 = por %p297_p2, %p296_p1 }
  0x12   :  { %259 = vmatpush3.bf16.msra.mxu0 %v256_v15 }
  0x13   :  { %261 = vmatprep.subr.bf16.mxu0 %v260_v18  ;;  %p299_p4 = pnand %p298_p3, %p292_p0 }
  0x16   :  { %263 = vmatpush3.bf16.msra.mxu0 %v260_v18 }
  0x17   :  { %265 = vmatprep.subr.bf16.mxu0 %v264_v21 }
  0x1a   :  { %267 = vmatpush3.bf16.msra.mxu0 %v264_v21 }
  0x1b   :  { %269 = vmatprep.subr.bf16.mxu0 %v268_v24 }
  0x1e   :  { %271 = vmatpush3.bf16.msra.mxu0 %v268_v24 }
  0x1f   :  { %273 = vmatprep.subr.bf16.mxu0 %v272_v27 }
  0x22   :  { %275 = vmatpush3.bf16.msra.mxu0 %v272_v27 }
  0x81   :  { %v23_v30 = vpop.permute.xlu0 %22 }
  0x82   :  { %vm27_vm0 = vcmp.eq.s32.totalorder %v18_v29, %v23_v30 }
  0x83   :  { %241 = vmatprep.mubr.msk.f32.mxu0 %vm27_vm0, %v316_v31 }
  0x85   :  { %v26_v32 = vpop.permute.xlu0 %25 }
  0x86   :  { %vm28_vm1 = vcmp.eq.s32.totalorder %v18_v29, %v26_v32 }
  0x87   :  { %242 = vmatmul.mubr.msk.f32.vlgmr.msra.gmra.mrb[0].mxu0 %vm28_vm1, %v316_v31 }
  0x89   :  { %v150_v44 = vpop.permute.xlu0 %149 }
  0x8a   :  { %vm154_vm2 = vcmp.eq.s32.totalorder %v18_v29, %v150_v44 }
 0x15a   :  { %v243_v33 = vpop.f32.mrb[0].mxu0 }
 0x15b   :  { %125 = vst [vmem:[#allocation2 + $0x8] sm:$0xff] %v243_v33  ;;  %128 = vmax.xlane.f32.xlu1 %v243_v33  ;;  %v115_v34 = vpop.f32.mrb[1].mxu0 }
 0x15c   :  { %124 = vst [vmem:[#allocation2] sm:$0xff] %v115_v34  ;;  %v156_v46 = vsel %vm154_vm2, %v115_v34, 0.0 }
 0x15f   :  { %126 = vmax.xlane.f32.xlu1 %v115_v34 }
 0x170   :  { %152 = vperm.xlu1 %282, %v147_v35  }
 0x1e8   :  { %v129_v36 = vpop.xlane.xlu1 %128 }
 0x1e9   :  { %v131_v37 = vsub.f32 %v243_v33, %v129_v36 }
 0x1eb   :  { %v134_v38 = vmul.f32 1.442695, %v131_v37 }
 0x1ec   :  { %v127_v39 = vpop.xlane.xlu1 %126 }
 0x1ed   :  { %283 = vpow2.f32 %v134_v38  ;;  %v130_v40 = vsub.f32 %v115_v34, %v127_v39 }
 0x1ef   :  { %v132_v41 = vmul.f32 1.442695, %v130_v40 }
 0x1f0   :  { %v153_v45 = vpop.permute.xlu1 %152 }
 0x1f1   :  { %285 = vpow2.f32 %v132_v41  ;;  %vm155_vm3 = vcmp.eq.s32.totalorder %v18_v29, %v153_v45 }
 0x1f2   :  { %v157_v47 = vsel %vm155_vm3, %v243_v33, 0.0 }
 0x1f7   :  { %v284_v42 = vpop.eup %283 }
 0x1f8   :  { %138 = vadd.xlane.f32.xlu1 %v284_v42 }
 0x1fb   :  { %v286_v43 = vpop.eup %285 }
 0x1fc   :  { %136 = vadd.xlane.f32.xlu0 %v286_v43 }
 0x200   :  { %158 = vadd.xlane.f32.xlu0 %v156_v46 }
 0x204   :  { %160 = vadd.xlane.f32.xlu0 %v157_v47 }
 0x205   :  { %302 = shalt.err (!%p299_p4)
}
 0x206   :  { %s303_s5 = scalar_lea.hbm %s426_s3, 256 }
 0x207   :  { %p304_p5 = scmp.ne.s32.totalorder %s426_s3, %s303_s5  ;;  %p307_p6 = scmp.lt.u32.totalorder %s303_s5, %s426_s3 }
 0x209   :  { %p309_p7 = pnand %p307_p6, %p304_p5 }
 0x20b   :  { %312 = shalt.err (!%p309_p7)
}
 0x20c   :  { %s318_s9 = smov 128   ;;  %s319_s10 = smov 8   ;;  %vm164_vm4 = vcmask 7168  }
 0x20d   :  { %178 = dma.vmem_to_hbm [thread:$0]  %s173_s27, 256, %s426_s3, [#allocation3], %s318_s9, %s318_s9, %s319_s10  }
 0x285   :  { %v139_v48 = vpop.xlane.xlu1 %138 }
 0x286   :  { %287 = vlog2.f32 %v139_v48 }
 0x289   :  { %v137_v49 = vpop.xlane.xlu0 %136 }
 0x28a   :  { %289 = vlog2.f32 %v137_v49 }
 0x28d   :  { %v159_v50 = vpop.xlane.xlu0 %158 }
 0x290   :  { %v288_v51 = vpop.eup %287 }
 0x291   :  { %v143_v52 = vmul.f32 0.6931472, %v288_v51  ;;  %v161_v55 = vpop.xlane.xlu0 %160 }
 0x293   :  { %v145_v53 = vadd.f32 %v143_v52, %v129_v36 }
 0x294   :  { %v290_v54 = vpop.eup %289 }
 0x295   :  { %v141_v56 = vmul.f32 0.6931472, %v290_v54  ;;  %v163_v57 = vsub.f32 %v145_v53, %v161_v55 }
 0x297   :  { %v144_v58 = vadd.f32 %v141_v56, %v127_v39  ;;  %166 = vst.msk [vmem:[%s427_s4 + $0x8] sm:$0xff] %vm164_vm4, %v163_v57 }
 0x299   :  { %v162_v59 = vsub.f32 %v144_v58, %v159_v50 }
 0x29b   :  { %165 = vst.msk [vmem:[%s427_s4] sm:$0xff] %vm164_vm4, %v162_v59 }
 0x29c   :  { %313 = dma.done.wait [#allocation3], 256  }
 0x29d   :  { %314 = vsyncadd [#allocation3], 4294967040 }
 0x29e   :  { %186 = vsyncpa [#allocation3], 1 }

</bundles_post_ra>
